<compile_context>
chip_gen: v7x
topology: tpu7x:2x2x1
jax: 0.10.0
libtpu: 0.0.40
codegen_flags: <defaults>
</compile_context>

<pallas_src>
import jax
import jax.numpy as jnp
from jax.experimental import pallas as pl
from jax.experimental.pallas import tpu as pltpu


# ----------------------------------------------------------------------------
# Spatial tile selection
# ----------------------------------------------------------------------------
def _choose_tn(M, c0, c1, Op, itemsize, max_tile, vmem_budget=24 << 20):
    """Pick the spatial tile width (lane axis)."""
    # Live bytes per spatial column: double-buffered inputs + double-buffered
    # outputs (weights/bias are resident and tiny, ignored here).
    bytes_per_col = 2 * (c0 + c1) * itemsize + 2 * 2 * Op * itemsize
    cap = (vmem_budget // max(bytes_per_col, 1)) // 128 * 128
    cap = max(128, min(max_tile, cap))
    if M <= cap:
        return M                         # single full-extent block
    # Prefer a multiple-of-128 divisor of M (no partial block at all).
    t = (cap // 128) * 128
    while t >= 128:
        if M % t == 0:
            return t
        t -= 128
    # Fallback: cdiv grid; Pallas masks the OOB columns on output writeback
    # (the 1x1 conv is column-independent, so garbage only hits dropped cols).
    return (cap // 128) * 128


# ----------------------------------------------------------------------------
# Pallas kernel: one detection level, both heads fused per grid step.
#   y0[b] = W0 @ x0[b] + b0      (main head, Implicit layers pre-folded)
#   y1[b] = W1 @ x1[b] + b1      (aux head)
# Weight-stationary orientation keeps the large spatial dim on the lane axis.
# ----------------------------------------------------------------------------
def _fused_level_call(x0, x1, w0, b0, w1, b1, *, max_tile=2048):
    """x0: (B, c0, M), x1: (B, c1, M) activations (NCHW flattened over spatial).
       w0: (Op, c0), b0: (Op, 1), w1: (Op, c1), b1: (Op, 1).
       Returns (y0, y1), each (B, Op, M) in conv layout."""
    B, c0, M = x0.shape
    _, c1, _ = x1.shape
    Op = w0.shape[0]
    dtype = x0.dtype
    itemsize = jnp.dtype(dtype).itemsize

    tn = _choose_tn(M, c0, c1, Op, itemsize, max_tile)
    nj = pl.cdiv(M, tn)

    def kernel(x0_ref, x1_ref, w0_ref, b0_ref, w1_ref, b1_ref, o0_ref, o1_ref):
        acc0 = jnp.dot(w0_ref[...], x0_ref[0],
                       preferred_element_type=jnp.float32)
        o0_ref[...] = (acc0 + b0_ref[...])[None].astype(o0_ref.dtype)
        acc1 = jnp.dot(w1_ref[...], x1_ref[0],
                       preferred_element_type=jnp.float32)
        o1_ref[...] = (acc1 + b1_ref[...])[None].astype(o1_ref.dtype)

    y0, y1 = pl.pallas_call(
        kernel,
        out_shape=(jax.ShapeDtypeStruct((B, Op, M), dtype),
                   jax.ShapeDtypeStruct((B, Op, M), dtype)),
        grid=(B, nj),
        in_specs=[
            pl.BlockSpec((1, c0, tn), lambda b, j: (b, 0, j)),   # main act
            pl.BlockSpec((1, c1, tn), lambda b, j: (b, 0, j)),   # aux act
            pl.BlockSpec((Op, c0), lambda b, j: (0, 0)),         # main weight
            pl.BlockSpec((Op, 1), lambda b, j: (0, 0)),          # main bias
            pl.BlockSpec((Op, c1), lambda b, j: (0, 0)),         # aux weight
            pl.BlockSpec((Op, 1), lambda b, j: (0, 0)),          # aux bias
        ],
        out_specs=(pl.BlockSpec((1, Op, tn), lambda b, j: (b, 0, j)),
                   pl.BlockSpec((1, Op, tn), lambda b, j: (b, 0, j))),
        compiler_params=pltpu.CompilerParams(
            dimension_semantics=("parallel", "parallel"),
            vmem_limit_bytes=32 << 20),
    )(x0, x1, w0, b0, w1, b1)
    return y0, y1


# ----------------------------------------------------------------------------
# JAX re-implementation of IAuxDetect (parameters built deterministically)
# ----------------------------------------------------------------------------
class IAuxDetectPallas:
    def __init__(self, nc, anchors, ch, key, max_tile=2048):
        self.nc = nc
        self.no = nc + 5
        self.nl = len(anchors)
        self.na = len(anchors[0]) // 2
        self.max_tile = max_tile
        a = jnp.asarray(anchors, jnp.float32).reshape(self.nl, -1, 2)
        self.anchors = a
        self.anchor_grid = a.reshape(self.nl, 1, -1, 1, 1, 2)

        O = self.no * self.na
        self.m_w, self.m_b = [], []     # main heads (1x1 conv)
        self.m2_w, self.m2_b = [], []   # aux heads  (1x1 conv)
        self.ia, self.im = [], []       # ImplicitA / ImplicitM

        keys = jax.random.split(key, 8 * self.nl)
        for i in range(self.nl):
            cin = ch[i]
            cin2 = ch[self.nl + i]
            k = keys[8 * i: 8 * (i + 1)]
            # nn.Conv2d default init: U(-1/sqrt(fan_in), 1/sqrt(fan_in))
            bnd = 1.0 / (cin ** 0.5)
            self.m_w.append(jax.random.uniform(k[0], (O, cin), jnp.float32, -bnd, bnd))
            self.m_b.append(jax.random.uniform(k[1], (O,), jnp.float32, -bnd, bnd))
            bnd2 = 1.0 / (cin2 ** 0.5)
            self.m2_w.append(jax.random.uniform(k[2], (O, cin2), jnp.float32, -bnd2, bnd2))
            self.m2_b.append(jax.random.uniform(k[3], (O,), jnp.float32, -bnd2, bnd2))
            # ImplicitA: N(0, 0.02); ImplicitM: N(1, 0.02)
            self.ia.append(0.02 * jax.random.normal(k[4], (cin,), jnp.float32))
            self.im.append(1.0 + 0.02 * jax.random.normal(k[5], (O,), jnp.float32))

    def _forward_level(self, i, x_main, x_aux):
        bs, c0, ny, nx = x_main.shape
        _, c1, _, _ = x_aux.shape      # module semantics force same bs, ny, nx
        O = self.na * self.no
        Op = -(-O // 8) * 8            # sublane-aligned output channels
        dtype = x_main.dtype

        # Fold ImplicitA / ImplicitM into the main conv (exact algebra):
        #   ((x + ia) W^T + b) * im  ==  x (W*im)^T + (W ia + b) * im
        w0 = self.m_w[i] * self.im[i][:, None]                      # (O, c0)
        b0 = (self.m_b[i] + self.m_w[i] @ self.ia[i]) * self.im[i]  # (O,)
        w1, b1 = self.m2_w[i], self.m2_b[i]                         # aux: plain conv

        if Op != O:                    # e.g. nc=80 -> O=255 -> pad to 256
            w0 = jnp.pad(w0, ((0, Op - O), (0, 0)))
            b0 = jnp.pad(b0, (0, Op - O))
            w1 = jnp.pad(w1, ((0, Op - O), (0, 0)))
            b1 = jnp.pad(b1, (0, Op - O))

        w0 = w0.astype(dtype)          # match activation dtype (bf16 welcome)
        w1 = w1.astype(dtype)
        b0 = b0[:, None]               # (Op, 1) f32
        b1 = b1[:, None]

        # NCHW is already (C, H*W) per batch: no transpose, just a free reshape.
        xm = x_main.reshape(bs, c0, ny * nx)
        xa = x_aux.reshape(bs, c1, ny * nx)

        y0, y1 = _fused_level_call(xm, xa, w0, b0, w1, b1,
                                   max_tile=self.max_tile)          # (bs, Op, M)

        def to_train_layout(t):
            # conv layout (bs, na*no, ny*nx) -> (bs, na, ny, nx, no)
            # matches torch .view(bs, na, no, ny, nx).permute(0, 1, 3, 4, 2)
            if Op != O:
                t = t[:, :O]
            t = t.reshape(bs, self.na, self.no, ny, nx)
            return jnp.transpose(t, (0, 1, 3, 4, 2))

        return to_train_layout(y0), to_train_layout(y1)

    def __call__(self, x):
        """x: list of 2*nl NCHW arrays. Returns list of 2*nl arrays shaped
        (bs, na, ny, nx, no) — training-mode forward semantics."""
        out = list(x)
        for i in range(self.nl):
            out[i], out[i + self.nl] = self._forward_level(i, x[i], x[i + self.nl])
        return out


# ----------------------------------------------------------------------------
# Pure-JAX reference (unfused math) for correctness check of the kernel
# ----------------------------------------------------------------------------
def _ref_head(xi, ia, w, b, im, na, no):
    bs, c, ny, nx = xi.shape
    x_bias = xi + ia.reshape(1, c, 1, 1)
    y = jnp.einsum('bchw,oc->bohw', x_bias, w) + b.reshape(1, -1, 1, 1)
    y = y * im.reshape(1, -1, 1, 1)
    y = y.reshape(bs, na, no, ny, nx)
    return jnp.transpose(y, (0, 1, 3, 4, 2))


def _check(model, xs, spatial, bs):
    outs = model(xs)
    outs = [jax.block_until_ready(o) for o in outs]
    for i in range(model.nl):
        ref_main = _ref_head(xs[i], model.ia[i], model.m_w[i], model.m_b[i],
                             model.im[i], model.na, model.no)
        c2 = xs[i + model.nl].shape[1]
        ref_aux = _ref_head(xs[i + model.nl], jnp.zeros((c2,), jnp.float32),
                            model.m2_w[i], model.m2_b[i],
                            jnp.ones((model.no * model.na,), jnp.float32),
                            model.na, model.no)
        s = spatial[i]
        assert outs[i].shape == (bs, model.na, s, s, model.no)
        assert outs[i + model.nl].shape == (bs, model.na, s, s, model.no)
        assert jnp.allclose(outs[i], ref_main, atol=2e-4, rtol=2e-4)
        assert jnp.allclose(outs[i + model.nl], ref_aux, atol=2e-4, rtol=2e-4)
    return outs


if __name__ == "__main__":
    key = jax.random.PRNGKey(0)
    k_params, k_in = jax.random.split(key)

    nc = 3                                             # num classes -> no = 8
    anchors = ((10, 13, 16, 30, 33, 23),
               (30, 61, 62, 45, 59, 119))              # nl = 2, na = 3
    ch = (16, 32, 16, 32)                              # main chans + aux chans
    bs = 2
    spatial = (16, 8)                                  # per detection level

    model = IAuxDetectPallas(nc, anchors, ch, k_params)

    # Build the input list: nl main feature maps + nl aux feature maps (NCHW).
    xs = []
    in_keys = jax.random.split(k_in, 2 * model.nl)
    for i in range(model.nl):
        s = spatial[i]
        xs.append(jax.random.normal(in_keys[i], (bs, ch[i], s, s), jnp.float32))
    for i in range(model.nl):
        s = spatial[i]
        xs.append(jax.random.normal(in_keys[model.nl + i],
                                    (bs, ch[model.nl + i], s, s), jnp.float32))

    # 1) default tiling: all levels take the single full-extent spatial block.
    _check(model, xs, spatial, bs)

    # 2) force a small tile cap to exercise the multi-block (lane-aligned
    #    divisor) path on the 16x16 level (M=256 -> two 128-wide blocks).
    model.max_tile = 128
    _check(model, xs, spatial, bs)

    print("KERNEL_OK")
</pallas_src>

<mosaic_0001>
module attributes {stable_mosaic.version = 11 : i64} {
  func.func @kernel(%arg0: i32, %arg1: i32, %arg2: memref<1x16x256xf32, #tpu.memory_space<vmem>>, %arg3: memref<1x16x256xf32, #tpu.memory_space<vmem>>, %arg4: memref<24x16xf32, #tpu.memory_space<vmem>>, %arg5: memref<24x1xf32, #tpu.memory_space<vmem>>, %arg6: memref<24x16xf32, #tpu.memory_space<vmem>>, %arg7: memref<24x1xf32, #tpu.memory_space<vmem>>, %arg8: memref<1x24x256xf32, #tpu.memory_space<vmem>>, %arg9: memref<1x24x256xf32, #tpu.memory_space<vmem>>) attributes {dimension_semantics = [#tpu.dimension_semantics<parallel>, #tpu.dimension_semantics<parallel>], iteration_bounds = array<i64: 2, 1>, scalar_prefetch = 0 : i64, scratch_operands = 0 : i64, tpu.core_type = #tpu.core_type<tc>, window_params = [{transform_indices = @transform_0, window_bounds = array<i64: 1, 16, 256>}, {transform_indices = @transform_1, window_bounds = array<i64: 1, 16, 256>}, {pipeline_mode = #tpu.pipeline_mode<synchronous>, transform_indices = @transform_2, window_bounds = array<i64: 24, 16>}, {pipeline_mode = #tpu.pipeline_mode<synchronous>, transform_indices = @transform_3, window_bounds = array<i64: 24, 1>}, {pipeline_mode = #tpu.pipeline_mode<synchronous>, transform_indices = @transform_4, window_bounds = array<i64: 24, 16>}, {pipeline_mode = #tpu.pipeline_mode<synchronous>, transform_indices = @transform_5, window_bounds = array<i64: 24, 1>}, {transform_indices = @transform_6, window_bounds = array<i64: 1, 24, 256>}, {transform_indices = @transform_7, window_bounds = array<i64: 1, 24, 256>}]} {
    %c0 = arith.constant 0 : index
    %c0_0 = arith.constant 0 : index
    %0 = vector.load %arg4[%c0, %c0_0] : memref<24x16xf32, #tpu.memory_space<vmem>>, vector<24x16xf32>
    %c0_1 = arith.constant 0 : index
    %c0_2 = arith.constant 0 : index
    %c0_3 = arith.constant 0 : index
    %1 = vector.load %arg2[%c0_1, %c0_2, %c0_3] : memref<1x16x256xf32, #tpu.memory_space<vmem>>, vector<1x16x256xf32>
    %2 = vector.shape_cast %1 : vector<1x16x256xf32> to vector<16x256xf32>
    %cst = arith.constant dense<0.000000e+00> : vector<24x256xf32>
    %3 = tpu.matmul %0, %2, %cst {dimension_numbers = #tpu.dot_dimension_numbers<[1], [0], [0], [1], [0, 0, 1, 1], [], []>} : vector<24x16xf32>, vector<16x256xf32>, vector<24x256xf32> -> vector<24x256xf32>
    %c0_4 = arith.constant 0 : index
    %c0_5 = arith.constant 0 : index
    %4 = vector.load %arg5[%c0_4, %c0_5] : memref<24x1xf32, #tpu.memory_space<vmem>>, vector<24x1xf32>
    %5 = vector.broadcast %4 : vector<24x1xf32> to vector<24x256xf32>
    %6 = arith.addf %3, %5 : vector<24x256xf32>
    %7 = vector.shape_cast %6 : vector<24x256xf32> to vector<1x24x256xf32>
    %c0_6 = arith.constant 0 : index
    %c0_7 = arith.constant 0 : index
    %c0_8 = arith.constant 0 : index
    %8 = vector.load %arg8[%c0_6, %c0_7, %c0_8] : memref<1x24x256xf32, #tpu.memory_space<vmem>>, vector<1x24x256xf32>
    tpu.vector_store %arg8[%c0_6, %c0_7, %c0_8], %7 {strides = array<i32>} : memref<1x24x256xf32, #tpu.memory_space<vmem>>, vector<1x24x256xf32>,
    %c0_9 = arith.constant 0 : index
    %c0_10 = arith.constant 0 : index
    %9 = vector.load %arg6[%c0_9, %c0_10] : memref<24x16xf32, #tpu.memory_space<vmem>>, vector<24x16xf32>
    %c0_11 = arith.constant 0 : index
    %c0_12 = arith.constant 0 : index
    %c0_13 = arith.constant 0 : index
    %10 = vector.load %arg3[%c0_11, %c0_12, %c0_13] : memref<1x16x256xf32, #tpu.memory_space<vmem>>, vector<1x16x256xf32>
    %11 = vector.shape_cast %10 : vector<1x16x256xf32> to vector<16x256xf32>
    %cst_14 = arith.constant dense<0.000000e+00> : vector<24x256xf32>
    %12 = tpu.matmul %9, %11, %cst_14 {dimension_numbers = #tpu.dot_dimension_numbers<[1], [0], [0], [1], [0, 0, 1, 1], [], []>} : vector<24x16xf32>, vector<16x256xf32>, vector<24x256xf32> -> vector<24x256xf32>
    %c0_15 = arith.constant 0 : index
    %c0_16 = arith.constant 0 : index
    %13 = vector.load %arg7[%c0_15, %c0_16] : memref<24x1xf32, #tpu.memory_space<vmem>>, vector<24x1xf32>
    %14 = vector.broadcast %13 : vector<24x1xf32> to vector<24x256xf32>
    %15 = arith.addf %12, %14 : vector<24x256xf32>
    %16 = vector.shape_cast %15 : vector<24x256xf32> to vector<1x24x256xf32>
    %c0_17 = arith.constant 0 : index
    %c0_18 = arith.constant 0 : index
    %c0_19 = arith.constant 0 : index
    %17 = vector.load %arg9[%c0_17, %c0_18, %c0_19] : memref<1x24x256xf32, #tpu.memory_space<vmem>>, vector<1x24x256xf32>
    tpu.vector_store %arg9[%c0_17, %c0_18, %c0_19], %16 {strides = array<i32>} : memref<1x24x256xf32, #tpu.memory_space<vmem>>, vector<1x24x256xf32>,
    return
  }
  func.func @transform_0(%arg0: i32, %arg1: i32) -> (i32, i32, i32) {
    %c0_i32 = arith.constant 0 : i32
    %c0_i32_0 = arith.constant 0 : i32
    return %arg0, %c0_i32, %arg1 : i32, i32, i32
  }
  func.func @transform_1(%arg0: i32, %arg1: i32) -> (i32, i32, i32) {
    %c0_i32 = arith.constant 0 : i32
    %c0_i32_0 = arith.constant 0 : i32
    return %arg0, %c0_i32, %arg1 : i32, i32, i32
  }
  func.func @transform_2(%arg0: i32, %arg1: i32) -> (i32, i32) {
    %c0_i32 = arith.constant 0 : i32
    %c0_i32_0 = arith.constant 0 : i32
    %c0_i32_1 = arith.constant 0 : i32
    return %c0_i32, %c0_i32_0 : i32, i32
  }
  func.func @transform_3(%arg0: i32, %arg1: i32) -> (i32, i32) {
    %c0_i32 = arith.constant 0 : i32
    %c0_i32_0 = arith.constant 0 : i32
    %c0_i32_1 = arith.constant 0 : i32
    return %c0_i32, %c0_i32_0 : i32, i32
  }
  func.func @transform_4(%arg0: i32, %arg1: i32) -> (i32, i32) {
    %c0_i32 = arith.constant 0 : i32
    %c0_i32_0 = arith.constant 0 : i32
    %c0_i32_1 = arith.constant 0 : i32
    return %c0_i32, %c0_i32_0 : i32, i32
  }
  func.func @transform_5(%arg0: i32, %arg1: i32) -> (i32, i32) {
    %c0_i32 = arith.constant 0 : i32
    %c0_i32_0 = arith.constant 0 : i32
    %c0_i32_1 = arith.constant 0 : i32
    return %c0_i32, %c0_i32_0 : i32, i32
  }
  func.func @transform_6(%arg0: i32, %arg1: i32) -> (i32, i32, i32) {
    %c0_i32 = arith.constant 0 : i32
    %c0_i32_0 = arith.constant 0 : i32
    return %arg0, %c0_i32, %arg1 : i32, i32, i32
  }
  func.func @transform_7(%arg0: i32, %arg1: i32) -> (i32, i32, i32) {
    %c0_i32 = arith.constant 0 : i32
    %c0_i32_0 = arith.constant 0 : i32
    return %arg0, %c0_i32, %arg1 : i32, i32, i32
  }
}

</mosaic_0001>

<bundles_post_ra>
// kernel: tpu_custom_call.1
= control target key start
LH: loop header
LB: loop body
LE: loop exit
PB: predicated region body
PF: predicated region fallthrough
CT: control target
= control target key end

     0   :  { %s1250_s0 = inlined_call_operand.vmem [shape: f32[2,16,256], index: 0, kind: input, shape index: {}]   ;;  %s1251_s1 = inlined_call_operand.vmem [shape: f32[2,16,256], index: 1, kind: input, shape index: {}]   ;;  %s1252_s2 = inlined_call_operand.vmem [shape: f32[24,16], index: 2, kind: input, shape index: {}]   ;;  %s1253_s3 = inlined_call_operand.vmem [shape: f32[24,1], index: 3, kind: input, shape index: {}]   ;;  %s1254_s4 = inlined_call_operand.vmem [shape: f32[24,16], index: 4, kind: input, shape index: {}]   ;;  %s1255_s5 = inlined_call_operand.vmem [shape: f32[24,1], index: 5, kind: input, shape index: {}]   ;;  %s1256_s6 = inlined_call_operand.hbm [shape: f32[2,24,256], index: 6, kind: output, shape index: {0}]   ;;  %s1257_s7 = inlined_call_operand.hbm [shape: f32[2,24,256], index: 7, kind: output, shape index: {1}]  }
   0x1   :  { %1258 = sst [smem:[#allocation8_spill]] %s1250_s0 }
   0x2   :  { %13 = vsyncpa [#allocation3], 0 }
   0x3   :  { %15 = vsyncpa [#allocation3 + $0x1], 0 }
   0x4   :  { %16 = vsyncpa [#allocation5], 0 }
   0x5   :  { %18 = vsyncpa [#allocation5 + $0x1], 0  ;;  %s1032_s24 = smov 0   ;;  %s1034_s25 = smov 0  }
   0x6   :  { %s1036_s26 = smov 0   ;;  %s1038_s27 = smov 0  }
   0x7   :  { %s1040_s28 = smov 0   ;;  %s1042_s29 = smov 0  }
   0x8 LB: > { %s776_s30 = sadd.s32 4294967295, %s984_s29   ;;  %s777_s8 = sadd.s32 4294967294, %s984_s29   ;;  %s984_s29 = sphi %s1042_s29, %s24_s29   ;;  %s980_s28 = sphi %s1040_s28, %s1266_s28   ;;  %s976_s27 = sphi %s1038_s27, %s1265_s27   ;;  %s972_s26 = sphi %s1036_s26, %s1264_s26   ;;  %s968_s25 = sphi %s1034_s25, %s1263_s25   ;;  %s964_s24 = sphi %s1032_s24, %s1262_s24  }
   0x9   : > { %s36_s9 = sadd.s32 1, %s980_s28  ;;  %s185_s10 = sadd.s32 1, %s972_s26 }
   0xa   : > { %p38_p0 = scmp.ge.s32.totalorder %s36_s9, 2  ;;  %p195_p1 = scmp.ne.s32.totalorder %s972_s26, %s968_s25 }
   0xb   : > { %p196_p2 = scmp.eq.s32.totalorder %s776_s30, 1  ;;  %p201_p3 = scmp.ne.s32.totalorder %s968_s25, %s964_s24 }
   0xc   : > { %s1268_s9 = smov (%p38_p0, %s36_s9), 0  ;;  %p202_p5 = scmp.eq.s32.totalorder %s777_s8, 1 }
   0xd   : > { %p1072_p4 = por %p196_p2, %p195_p1  ;;  %s180_s12 = ssub.s32 %s980_s28, %s1268_s9 }
   0xe   : > { %p780_p6 = scmp.ge.s32.totalorder %s984_s29, 1  ;;  %p183_p7 = scmp.eq.s32.totalorder %s180_s12, 0 }
   0xf   : > { %p1079_p8 = por %p202_p5, %p201_p3  ;;  %p286_p9 = scmp.lt.s32.totalorder %s984_s29, 3 }
  0x10   : > { %s1085_s14 = scalar_select %p183_p7, %s972_s26, %s185_s10  }
  0x11   : > { %p287_p10 = pnand %p780_p6, %p286_p9 }
  0x12   : > { %p337_p11 = scmp.lt.s32.totalorder (!%p287_p10), %s976_s27, 1  ;;  %v986_v0 = vmov (!%p287_p10), 0.0   ;;  %v987_v1 = vmov (!%p287_p10), 0   ;;  %v367_v2 = vld [vmem:[%s1253_s3 + $0x10] sm:$0xff] (!%p287_p10)  ;;  %v365_v3 = vld [vmem:[%s1253_s3] sm:$0xff] (!%p287_p10)  ;;  %v366_v5 = vld [vmem:[%s1253_s3 + $0x8] sm:$0xff] (!%p287_p10) }
  0x13   : > { %290 = sbr.rel (%p287_p10) target bundleno = 299 (0x12b), region = 44  ;;  %457 = vmatprep.mubr.f32.mxu0 (!%p287_p10), %v986_v0  ;;  %580 = vmatprep.mubr.f32.mxu1 (!%p287_p10), %v986_v0  ;;  %v489_v4 = vld [vmem:[%s1255_s5] sm:$0xff] (!%p287_p10)  ;;  %s1261_s0 = sld [smem:[#allocation8_spill]] (!%p287_p10)  ;;  %v491_v17 = vld [vmem:[%s1255_s5 + $0x10] sm:$0xff] (!%p287_p10)  ;;  %v490_v19 = vld [vmem:[%s1255_s5 + $0x8] sm:$0xff] (!%p287_p10)  ;;  %vm383_vm0 = vcmask (!%p287_p10), 130048  }
  0x14   : > { %873 = vset.pattern.permute.xlu1 (!%p287_p10), %v987_v1  ;;  %872 = vset.pattern.permute.xlu0 (!%p287_p10), %v987_v1  ;;  %v358_v20 = vld [vmem:[%s1252_s2] sm:$0xff] (!%p287_p10)  ;;  %v359_v22 = vld [vmem:[%s1252_s2 + $0x8] sm:$0xff] (!%p287_p10)  ;;  %v360_v24 = vld [vmem:[%s1252_s2 + $0x10] sm:$0xff] (!%p287_p10)  ;;  %s1138_s21 = sand.u32 (!%p287_p10), 1, %s968_s25   ;;  %s806_s8 = smul.u32 (!%p287_p10), 768, %s976_s27 }
  0x15   : > { %380 = vperm.xlu1 (!%p287_p10), %873, %v367_v2   ;;  %370 = vperm.xlu0 (!%p287_p10), %872, %v365_v3   ;;  %v482_v21 = vld [vmem:[%s1254_s4] sm:$0xff] (!%p287_p10)  ;;  %v483_v23 = vld [vmem:[%s1254_s4 + $0x8] sm:$0xff] (!%p287_p10)  ;;  %v484_v25 = vld [vmem:[%s1254_s4 + $0x10] sm:$0xff] (!%p287_p10)  ;;  %s805_s22 = smul.u32 (!%p287_p10), 48, %s1138_s21 }
  0x16   : > { %s1161_s17 = scalar_lea.hbm (!%p287_p10), %s1256_s6, %s806_s8  ;;  %s1169_s19 = scalar_lea.hbm (!%p287_p10), %s1257_s7, %s806_s8 }
  0x17   : > { %s1141_s23 = scalar_lea.vmem (!%p287_p10), [#allocation2], %s805_s22  ;;  %s1144_s30 = scalar_lea.vmem (!%p287_p10), [#allocation4], %s805_s22 }
  0x18   : > { %s626_s10 = sshll.u32 (!%p287_p10), %s1141_s23, 4  ;;  %s1155_s10 = int_to_ptr.vmem [resolvable:$true] %s626_s10 }
  0x19   : > { %494 = vperm.xlu1 (!%p287_p10), %873, %v489_v4   ;;  %375 = vperm.xlu0 (!%p287_p10), %872, %v366_v5   ;;  %s874_s22 = scalar_lea.vmem (!%p287_p10), %s1155_s10, 768 }
  0x1a   : > { %s338_s15 = scalar_select %p337_p11, %s976_s27, 1 }
  0x1b   : > { %p875_p12 = scmp.ne.s32.totalorder %s1155_s10, %s874_s22  ;;  %s988_s27 = smov [#allocation2]  }
  0x1c   : > { %s795_s20 = sshll.u32 %s338_s15, 5  ;;  %s878_s16 = sshll.u32 %s988_s27, 4  ;;  %s879_s16 = int_to_ptr.vmem [resolvable:$false] %s878_s16 }
  0x1d   : > { %s344_s12 = scalar_lea.vmem %s1261_s0, %s795_s20  ;;  %s354_s18 = scalar_lea.vmem %s1251_s1, %s795_s20  ;;  %504 = vperm.xlu1 %873, %v491_v17   ;;  %499 = vperm.xlu0 %872, %v490_v19  }
  0x1e   : > { %v362_v6 = vld [vmem:[%s344_s12 + $0x8] sm:$0xff]  ;;  %v364_v7 = vld [vmem:[%s344_s12 + $0x18] sm:$0xff]  ;;  %v361_v11 = vld [vmem:[%s344_s12] sm:$0xff]  ;;  %s606_s20 = scalar_lea.sflag [#allocation3], %s1138_s21  ;;  %p876_p13 = pnand %p875_p12, %p1072_p4 }
  0x1f   : > { %v486_v8 = vld [vmem:[%s354_s18 + $0x8] sm:$0xff]  ;;  %v797_v9 = vpack.c.bf16 %v364_v7, %v362_v6  ;;  %v488_v10 = vld [vmem:[%s354_s18 + $0x18] sm:$0xff]  ;;  %v363_v12 = vld [vmem:[%s344_s12 + $0x10] sm:$0xff]  ;;  %s644_s12 = sshll.u32 %s1144_s30, 4  ;;  %s880_s0 = scalar_lea.vmem %s879_s16, 1536  ;;  %s1163_s12 = int_to_ptr.vmem [resolvable:$true] %s644_s12 }
  0x20   : > { %v801_v13 = vpack.c.bf16 %v488_v10, %v486_v8  ;;  %v799_v14 = vpack.c.bf16 %v363_v12, %v361_v11  ;;  %v485_v15 = vld [vmem:[%s354_s18] sm:$0xff]  ;;  %v487_v16 = vld [vmem:[%s354_s18 + $0x10] sm:$0xff]  ;;  %p877_p0 = pneg %p876_p13  ;;  %p881_p1 = scmp.lt.s32.totalorder %s1155_s10, %s879_s16 }
  0x21   : > { %798 = vmatprep.subr.bf16.mxu0 %v797_v9  ;;  %v803_v18 = vpack.c.bf16 %v487_v16, %v485_v15  ;;  %p882_p2 = scmp.lt.s32.totalorder %s880_s0, %s874_s22 }
  0x22   : > { %802 = vmatprep.subr.bf16.mxu1 %v801_v13  ;;  %800 = vmatpush1.bf16.msra.mxu0 %v799_v14 }
  0x23   : > { %804 = vmatpush1.bf16.msra.mxu1 %v803_v18  ;;  %p883_p3 = por %p882_p2, %p881_p1 }
  0x25   : > { %785 = vmatmul.mubr.msk.f32.vlgmr.msra.gmra.mrb[0].mxu0 %vm383_vm0, %v358_v20  ;;  %p884_p5 = pnand %p883_p3, %p877_p0 }
  0x26   : > { %788 = vmatmul.mubr.msk.f32.vlgmr.msra.gmra.mrb[0].mxu1 %vm383_vm0, %v482_v21  ;;  %463 = vmatprep.mubr.f32.mxu0 %v986_v0 }
  0x27   : > { %586 = vmatprep.mubr.f32.mxu1 %v986_v0 }
  0x29   : > { %786 = vmatmul.mubr.msk.f32.gmra.mrb[2].mxu0 %vm383_vm0, %v359_v22 }
  0x2a   : > { %789 = vmatmul.mubr.msk.f32.gmra.mrb[2].mxu1 %vm383_vm0, %v483_v23  ;;  %469 = vmatprep.mubr.f32.mxu0 %v986_v0 }
  0x2b   : > { %592 = vmatprep.mubr.f32.mxu1 %v986_v0 }
  0x2d   : > { %787 = vmatmul.mubr.msk.f32.gmra.mrb[4].mxu0 %vm383_vm0, %v360_v24 }
  0x2e   : > { %790 = vmatmul.mubr.msk.f32.gmra.mrb[4].mxu1 %vm383_vm0, %v484_v25 }
  0x94   : > { %v371_v26 = vpop.permute.xlu0 %370  ;;  %v381_v27 = vpop.permute.xlu1 %380 }
  0x98   : > { %v376_v28 = vpop.permute.xlu0 %375  ;;  %v495_v29 = vpop.permute.xlu1 %494 }
  0x9c   : > { %v500_v38 = vpop.permute.xlu0 %499  ;;  %v505_v47 = vpop.permute.xlu1 %504 }
  0xf8   : > { %v459_v30 = vpop.f32.mrb[0].mxu0 }
  0xf9   : > { %v460_v31 = vadd.f32 %v459_v30, %v371_v26  ;;  %v582_v32 = vpop.f32.mrb[0].mxu1  ;;  %v461_v33 = vpop.f32.mrb[1].mxu0 }
  0xfa   : > { %v583_v34 = vadd.f32 %v582_v32, %v495_v29  ;;  %v462_v35 = vadd.f32 %v461_v33, %v371_v26  ;;  %v584_v36 = vpop.f32.mrb[1].mxu1 }
  0xfb   : > { %476 = vst [vmem:[%s1141_s23] sm:$0xff] %v460_v31  ;;  %v585_v37 = vadd.f32 %v584_v36, %v495_v29 }
  0xfc   : > { %599 = vst [vmem:[%s1144_s30] sm:$0xff] %v583_v34  ;;  %477 = vst [vmem:[%s1141_s23 + $0x8] sm:$0xff] %v462_v35  ;;  %v465_v39 = vpop.f32.mrb[2].mxu0 }
  0xfd   : > { %600 = vst [vmem:[%s1144_s30 + $0x8] sm:$0xff] %v585_v37  ;;  %v466_v40 = vadd.f32 %v465_v39, %v376_v28  ;;  %v588_v41 = vpop.f32.mrb[2].mxu1  ;;  %v467_v42 = vpop.f32.mrb[3].mxu0 }
  0xfe   : > { %v589_v43 = vadd.f32 %v588_v41, %v500_v38  ;;  %v468_v44 = vadd.f32 %v467_v42, %v376_v28  ;;  %v590_v45 = vpop.f32.mrb[3].mxu1 }
  0xff   : > { %478 = vst [vmem:[%s1141_s23 + $0x10] sm:$0xff] %v466_v40  ;;  %v591_v46 = vadd.f32 %v590_v45, %v500_v38 }
 0x100   : > { %601 = vst [vmem:[%s1144_s30 + $0x10] sm:$0xff] %v589_v43  ;;  %479 = vst [vmem:[%s1141_s23 + $0x18] sm:$0xff] %v468_v44  ;;  %v471_v48 = vpop.f32.mrb[4].mxu0 }
 0x101   : > { %602 = vst [vmem:[%s1144_s30 + $0x18] sm:$0xff] %v591_v46  ;;  %v472_v49 = vadd.f32 %v471_v48, %v381_v27  ;;  %v594_v50 = vpop.f32.mrb[4].mxu1  ;;  %v473_v51 = vpop.f32.mrb[5].mxu0 }
 0x102   : > { %v595_v52 = vadd.f32 %v594_v50, %v505_v47  ;;  %v474_v53 = vadd.f32 %v473_v51, %v381_v27  ;;  %v596_v54 = vpop.f32.mrb[5].mxu1 }
 0x103   : > { %480 = vst [vmem:[%s1141_s23 + $0x20] sm:$0xff] %v472_v49  ;;  %v597_v55 = vadd.f32 %v596_v54, %v505_v47 }
 0x104   : > { %603 = vst [vmem:[%s1144_s30 + $0x20] sm:$0xff] %v595_v52  ;;  %481 = vst [vmem:[%s1141_s23 + $0x28] sm:$0xff] %v474_v53 }
 0x105   : > { %604 = vst [vmem:[%s1144_s30 + $0x28] sm:$0xff] %v597_v55 }
 0x106   : > { %887 = shalt.err (!%p884_p5)
}
 0x107   : > { %s888_s23 = scalar_lea.hbm %s1161_s17, 768  ;;  %s892_s18 = scalar_lea.hbm %s1256_s6, 1536 }
 0x108   : > { %p889_p6 = scmp.ne.s32.totalorder %s1161_s17, %s888_s23  ;;  %p893_p10 = scmp.lt.u32.totalorder %s1161_s17, %s1256_s6 }
 0x109   : > { %p894_p11 = scmp.lt.u32.totalorder %s892_s18, %s888_s23  ;;  %p896_p13 = scmp.lt.u32.totalorder %s888_s23, %s1161_s17 }
 0x10a   : > { %p890_p7 = pnand %p889_p6, %p1072_p4 }
 0x10b   : > { %p895_p12 = por %p894_p11, %p893_p10 }
 0x10c   : > { %p891_p9 = pneg %p890_p7 }
 0x10d   : > { %p897_p0 = por %p896_p13, %p895_p12 }
 0x10f   : > { %p898_p1 = pnand %p897_p0, %p891_p9 }
 0x111   : > { %901 = shalt.err (!%p898_p1)
}
 0x112   : > { %s989_s0 = smov 256   ;;  %s990_s22 = smov 16  }
 0x113   : > { %808 = dma.vmem_to_hbm [thread:$0]  (%p1072_p4), %s1155_s10, 768, %s1161_s17, %s606_s20, %s989_s0, %s989_s0, %s990_s22  }
 0x114   : > { %s611_s16 = scalar_lea.sflag [#allocation5], %s1138_s21  ;;  %s902_s23 = scalar_lea.vmem %s1163_s12, 768 }
 0x115   : > { %p903_p2 = scmp.ne.s32.totalorder %s1163_s12, %s902_s23  ;;  %s991_s30 = smov [#allocation4]  }
 0x116   : > { %s906_s8 = sshll.u32 %s991_s30, 4  ;;  %s907_s8 = int_to_ptr.vmem [resolvable:$false] %s906_s8 }
 0x117   : > { %p904_p3 = pnand %p903_p2, %p1072_p4  ;;  %s908_s18 = scalar_lea.vmem %s907_s8, 1536 }
 0x118   : > { %p909_p6 = scmp.lt.s32.totalorder %s1163_s12, %s907_s8  ;;  %p910_p7 = scmp.lt.s32.totalorder %s908_s18, %s902_s23 }
 0x119   : > { %p905_p5 = pneg %p904_p3 }
 0x11a   : > { %p911_p9 = por %p910_p7, %p909_p6 }
 0x11c   : > { %p912_p10 = pnand %p911_p9, %p905_p5 }
 0x11e   : > { %915 = shalt.err (!%p912_p10)
}
 0x11f   : > { %s916_s10 = scalar_lea.hbm %s1169_s19, 768  ;;  %s920_s15 = scalar_lea.hbm %s1257_s7, 1536 }
 0x120   : > { %p917_p11 = scmp.ne.s32.totalorder %s1169_s19, %s916_s10  ;;  %p921_p0 = scmp.lt.u32.totalorder %s1169_s19, %s1257_s7 }
 0x121   : > { %p922_p1 = scmp.lt.u32.totalorder %s920_s15, %s916_s10  ;;  %p924_p3 = scmp.lt.u32.totalorder %s916_s10, %s1169_s19 }
 0x122   : > { %p918_p12 = pnand %p917_p11, %p1072_p4 }
 0x123   : > { %p923_p2 = por %p922_p1, %p921_p0 }
 0x124   : > { %p919_p13 = pneg %p918_p12 }
 0x125   : > { %p925_p5 = por %p924_p3, %p923_p2 }
 0x127   : > { %p926_p6 = pnand %p925_p5, %p919_p13 }
 0x129   : > { %929 = shalt.err (!%p926_p6)
}
 0x12a   : > { %809 = dma.vmem_to_hbm [thread:$0]  (%p1072_p4), %s1163_s12, 768, %s1169_s19, %s611_s16, %s989_s0, %s989_s0, %s990_s22  }
 0x12b PF: > { %p819_p7 = scmp.ge.s32.totalorder %s984_s29, 2  ;;  %s659_s23 = sand.u32 1, %s964_s24  }
 0x12c   : > { %s660_s8 = scalar_lea.sflag [#allocation3], %s659_s23 }
 0x12d   : > { %p813_p9 = pnand %p819_p7, %p1079_p8 }
 0x12f   : > { %955 = dma.done.wait (!%p813_p9), %s660_s8, 768  }
 0x130   : > { %957 = vsyncadd (!%p813_p9), %s660_s8, 4294966528  ;;  %s669_s11 = scalar_lea.sflag [#allocation5], %s659_s23 }
 0x131   : > { %959 = dma.done.wait (!%p813_p9), %s669_s11, 768  }
 0x132   : > { %961 = vsyncadd (!%p813_p9), %s669_s11, 4294966528  ;;  %s24_s29 = sadd.s32 1, %s984_s29   ;;  %s1262_s24 = smov %s968_s25 }
 0x133   : > { %p21_p10 = scmp.ge.s32.totalorder %s24_s29, 4   ;;  %s1263_s25 = smov %s972_s26 }
 0x134   : > { %s1264_s26 = smov %s1085_s14  ;;  %s1265_s27 = smov %s980_s28 }
 0x135   : > { %s1266_s28 = smov %s1268_s9  ;;  %23 = sbr.rel (!%p21_p10) target bundleno = 8 (0x8), region = 99 }
 0x13c   :  { %674 = vsyncpa [#allocation3], 1 }
 0x13d   :  { %676 = vsyncpa [#allocation3 + $0x1], 1 }
 0x13e   :  { %677 = vsyncpa [#allocation5], 1 }
 0x13f   :  { %679 = vsyncpa [#allocation5 + $0x1], 1 }

</bundles_post_ra>
